<compile_context>
chip_gen: v6e
topology: v6e:2x2x1
jax: 0.10.0
libtpu: 0.0.40
codegen_flags: <defaults>
</compile_context>

<pallas_src>
import math

import jax
import jax.numpy as jnp
from jax.experimental import pallas as pl
from jax.experimental.pallas import tpu as pltpu


def _round_up(x, m):
    return ((x + m - 1) // m) * m


def _sinusoid_table(n, d_model):
    """Sinusoidal table used by PositionalEmbedding and FixedEmbedding (d_model assumed even)."""
    position = jnp.arange(n, dtype=jnp.float32)[:, None]
    div_term = jnp.exp(jnp.arange(0, d_model, 2, dtype=jnp.float32)
                       * (-math.log(10000.0) / d_model))
    tab = jnp.zeros((n, d_model), jnp.float32)
    tab = tab.at[:, 0::2].set(jnp.sin(position * div_term))
    tab = tab.at[:, 1::2].set(jnp.cos(position * div_term))
    return tab


# ---------------- kernels ----------------

def _embed_kernel(xu_ref, w_ref, pe_ref, o_ref):
    # xu_ref: (tl, 3*c_in)  im2col tile of the input sequence (batch dim squeezed)
    # w_ref:  (3*c_in, D)   flattened conv weight (same block every step)
    # pe_ref: (tl, D)       positional-embedding tile
    # o_ref:  (tl, D)       lane-dense output tile (D is a multiple of 128)
    v = jnp.dot(xu_ref[...], w_ref[...], preferred_element_type=jnp.float32)
    o_ref[...] = (v + pe_ref[...]).astype(o_ref.dtype)


def _embed_temporal_kernel(xu_ref, w_ref, pe_ref, te_ref, o_ref):
    v = jnp.dot(xu_ref[...], w_ref[...], preferred_element_type=jnp.float32)
    o_ref[...] = (v + pe_ref[...] + te_ref[...]).astype(o_ref.dtype)


# ---------------- wrapper ----------------

def data_embedding_forward(x, conv_weight, x_mark=None, temporal_tables=None,
                           *, tl=512, out_dtype=None):
    """x: [B, c_in, L] float.  conv_weight: [d_model, c_in, 3] (PyTorch Conv1d layout).
    x_mark: optional int [B, L, n_feat] with columns (month, day, weekday, hour[, minute]).
    temporal_tables: dict of fixed-embedding tables (required when x_mark is given).
    Returns [B, L, d_model] (MOMENT/TimesNet/GPT4TS positional-embedding slicing)."""
    B, c_in, L = x.shape
    d_model = conv_weight.shape[0]
    out_dtype = x.dtype if out_dtype is None else out_dtype

    # --- glue (plain JAX): im2col for the circular kernel-size-3 conv ---
    x_m1 = jnp.roll(x, 1, axis=-1)     # x[..., (t-1) % L]
    x_p1 = jnp.roll(x, -1, axis=-1)    # x[..., (t+1) % L]
    x_unf = jnp.stack([x_m1, x, x_p1], axis=-1)               # [B, c_in, L, 3]
    x_unf = x_unf.transpose(0, 2, 1, 3).reshape(B, L, 3 * c_in)
    w_flat = conv_weight.transpose(1, 2, 0).reshape(3 * c_in, d_model)  # [3*c_in, d_model]

    # --- pad to lane/sublane friendly sizes (no divisibility asserts) ---
    K3 = 3 * c_in
    tl_eff = min(tl, _round_up(L, 8))          # time tile, multiple of 8
    L_pad = _round_up(L, tl_eff)
    D_pad = _round_up(d_model, 128)            # lane-dense output stores

    if L_pad != L:
        x_unf = jnp.pad(x_unf, ((0, 0), (0, L_pad - L), (0, 0)))
    if D_pad != d_model:
        w_flat = jnp.pad(w_flat, ((0, 0), (0, D_pad - d_model)))

    # positional embedding (pe[:, :x.size(2)] of the original), built for the padded length
    pe = _sinusoid_table(L_pad, d_model)
    if D_pad != d_model:
        pe = jnp.pad(pe, ((0, 0), (0, D_pad - d_model)))

    # optional temporal embedding (fixed sinusoidal lookup tables, summed) — tiny gathers in JAX
    te = None
    if x_mark is not None:
        idx = x_mark.astype(jnp.int32)
        te = (jnp.take(temporal_tables['hour'], idx[:, :, 3], axis=0)
              + jnp.take(temporal_tables['weekday'], idx[:, :, 2], axis=0)
              + jnp.take(temporal_tables['day'], idx[:, :, 1], axis=0)
              + jnp.take(temporal_tables['month'], idx[:, :, 0], axis=0))
        if 'minute' in temporal_tables and idx.shape[-1] > 4:
            te = te + jnp.take(temporal_tables['minute'], idx[:, :, 4], axis=0)
        te = jnp.pad(te, ((0, 0), (0, L_pad - L), (0, D_pad - d_model)))

    grid = (B, L_pad // tl_eff)

    xu_spec = pl.BlockSpec((None, tl_eff, K3), lambda b, l: (b, l, 0))
    w_spec = pl.BlockSpec((K3, D_pad), lambda b, l: (0, 0))
    pe_spec = pl.BlockSpec((tl_eff, D_pad), lambda b, l: (l, 0))
    out_spec = pl.BlockSpec((None, tl_eff, D_pad), lambda b, l: (b, l, 0))

    cparams = pltpu.CompilerParams(
        dimension_semantics=("parallel", "parallel"),
        vmem_limit_bytes=64 * 1024 * 1024)

    if te is None:
        out = pl.pallas_call(
            _embed_kernel,
            out_shape=jax.ShapeDtypeStruct((B, L_pad, D_pad), out_dtype),
            grid_spec=pltpu.PrefetchScalarGridSpec(
                num_scalar_prefetch=0, grid=grid,
                in_specs=[xu_spec, w_spec, pe_spec],
                out_specs=out_spec),
            compiler_params=cparams,
        )(x_unf, w_flat, pe)
    else:
        te_spec = pl.BlockSpec((None, tl_eff, D_pad), lambda b, l: (b, l, 0))
        out = pl.pallas_call(
            _embed_temporal_kernel,
            out_shape=jax.ShapeDtypeStruct((B, L_pad, D_pad), out_dtype),
            grid_spec=pltpu.PrefetchScalarGridSpec(
                num_scalar_prefetch=0, grid=grid,
                in_specs=[xu_spec, w_spec, pe_spec, te_spec],
                out_specs=out_spec),
            compiler_params=cparams,
        )(x_unf, w_flat, pe, te)

    # TODO(synk): dropout is identity at inference; training-mode dropout (pltpu.prng_*) not implemented.
    return out[:, :L, :d_model]


if __name__ == "__main__":
    # Small, forward-consistent shapes: x is [batch, channels(c_in), seq_len]; d_model multiple of 128.
    B, c_in, L = 2, 4, 64
    d_model = 128

    key = jax.random.PRNGKey(0)
    kx, kw, kt = jax.random.split(key, 3)

    x = jax.random.normal(kx, (B, c_in, L), jnp.float32)
    # Conv1d(c_in, d_model, kernel_size=3, bias=False) weight, kaiming-style scale (deterministic)
    conv_weight = jax.random.normal(kw, (d_model, c_in, 3), jnp.float32) * math.sqrt(2.0 / (c_in * 3))

    # fixed temporal embedding tables (embed_type='fixed', freq='h')
    temporal_tables = {
        'hour': _sinusoid_table(24, d_model),
        'weekday': _sinusoid_table(7, d_model),
        'day': _sinusoid_table(32, d_model),
        'month': _sinusoid_table(13, d_model),
    }
    x_mark = jnp.stack([
        jax.random.randint(jax.random.fold_in(kt, 0), (B, L), 0, 13),   # month
        jax.random.randint(jax.random.fold_in(kt, 1), (B, L), 0, 32),   # day
        jax.random.randint(jax.random.fold_in(kt, 2), (B, L), 0, 7),    # weekday
        jax.random.randint(jax.random.fold_in(kt, 3), (B, L), 0, 24),   # hour
    ], axis=-1)

    # ---- run kernels ----
    out = data_embedding_forward(x, conv_weight)                               # x_mark=None path
    out = jax.block_until_ready(out)
    out_t = data_embedding_forward(x, conv_weight, x_mark=x_mark,
                                   temporal_tables=temporal_tables)            # temporal path
    out_t = jax.block_until_ready(out_t)

    # ---- pure-JAX references ----
    x_m1 = jnp.roll(x, 1, axis=-1)
    x_p1 = jnp.roll(x, -1, axis=-1)
    v = (jnp.einsum('bct,dc->btd', x_m1, conv_weight[:, :, 0])
         + jnp.einsum('bct,dc->btd', x, conv_weight[:, :, 1])
         + jnp.einsum('bct,dc->btd', x_p1, conv_weight[:, :, 2]))
    pe = _sinusoid_table(L, d_model)
    ref = v + pe[None]
    te = (jnp.take(temporal_tables['hour'], x_mark[:, :, 3], axis=0)
          + jnp.take(temporal_tables['weekday'], x_mark[:, :, 2], axis=0)
          + jnp.take(temporal_tables['day'], x_mark[:, :, 1], axis=0)
          + jnp.take(temporal_tables['month'], x_mark[:, :, 0], axis=0))
    ref_t = ref + te

    assert out.shape == (B, L, d_model)
    assert jnp.allclose(out, ref, atol=1e-4, rtol=1e-4)
    assert jnp.allclose(out_t, ref_t, atol=1e-4, rtol=1e-4)

    print("KERNEL_OK")
</pallas_src>

<mosaic_0001>
module attributes {stable_mosaic.version = 11 : i64} {
  func.func @_embed_kernel(%arg0: i32, %arg1: i32, %arg2: memref<1x64x12xf32, #tpu.memory_space<vmem>>, %arg3: memref<12x128xf32, #tpu.memory_space<vmem>>, %arg4: memref<64x128xf32, #tpu.memory_space<vmem>>, %arg5: memref<1x64x128xf32, #tpu.memory_space<vmem>>) attributes {dimension_semantics = [#tpu.dimension_semantics<parallel>, #tpu.dimension_semantics<parallel>], iteration_bounds = array<i64: 2, 1>, scalar_prefetch = 0 : i64, scratch_operands = 0 : i64, tpu.core_type = #tpu.core_type<tc>, window_params = [{transform_indices = @transform_0, window_bounds = array<i64: 1, 64, 12>}, {pipeline_mode = #tpu.pipeline_mode<synchronous>, transform_indices = @transform_1, window_bounds = array<i64: 12, 128>}, {transform_indices = @transform_2, window_bounds = array<i64: 64, 128>}, {transform_indices = @transform_3, window_bounds = array<i64: 1, 64, 128>}]} {
    %c0 = arith.constant 0 : index
    %c0_0 = arith.constant 0 : index
    %c0_1 = arith.constant 0 : index
    %0 = vector.load %arg2[%c0, %c0_0, %c0_1] : memref<1x64x12xf32, #tpu.memory_space<vmem>>, vector<1x64x12xf32>
    %1 = vector.shape_cast %0 : vector<1x64x12xf32> to vector<64x12xf32>
    %c0_2 = arith.constant 0 : index
    %c0_3 = arith.constant 0 : index
    %2 = vector.load %arg3[%c0_2, %c0_3] : memref<12x128xf32, #tpu.memory_space<vmem>>, vector<12x128xf32>
    %cst = arith.constant dense<0.000000e+00> : vector<64x128xf32>
    %3 = tpu.matmul %1, %2, %cst {dimension_numbers = #tpu.dot_dimension_numbers<[1], [0], [0], [1], [0, 0, 1, 1], [], []>} : vector<64x12xf32>, vector<12x128xf32>, vector<64x128xf32> -> vector<64x128xf32>
    %c0_4 = arith.constant 0 : index
    %c0_5 = arith.constant 0 : index
    %4 = vector.load %arg4[%c0_4, %c0_5] : memref<64x128xf32, #tpu.memory_space<vmem>>, vector<64x128xf32>
    %5 = arith.addf %3, %4 : vector<64x128xf32>
    %c0_6 = arith.constant 0 : index
    %c0_7 = arith.constant 0 : index
    %c0_8 = arith.constant 0 : index
    %6 = vector.load %arg5[%c0_6, %c0_7, %c0_8] : memref<1x64x128xf32, #tpu.memory_space<vmem>>, vector<1x64x128xf32>
    %7 = vector.shape_cast %6 : vector<1x64x128xf32> to vector<64x128xf32>
    %8 = vector.shape_cast %5 : vector<64x128xf32> to vector<1x64x128xf32>
    tpu.vector_store %arg5[%c0_6, %c0_7, %c0_8], %8 {strides = array<i32>} : memref<1x64x128xf32, #tpu.memory_space<vmem>>, vector<1x64x128xf32>,
    return
  }
  func.func @transform_0(%arg0: i32, %arg1: i32) -> (i32, i32, i32) {
    %c0_i32 = arith.constant 0 : i32
    %c0_i32_0 = arith.constant 0 : i32
    return %arg0, %arg1, %c0_i32 : i32, i32, i32
  }
  func.func @transform_1(%arg0: i32, %arg1: i32) -> (i32, i32) {
    %c0_i32 = arith.constant 0 : i32
    %c0_i32_0 = arith.constant 0 : i32
    %c0_i32_1 = arith.constant 0 : i32
    return %c0_i32, %c0_i32_0 : i32, i32
  }
  func.func @transform_2(%arg0: i32, %arg1: i32) -> (i32, i32) {
    %c0_i32 = arith.constant 0 : i32
    %c0_i32_0 = arith.constant 0 : i32
    return %arg1, %c0_i32 : i32, i32
  }
  func.func @transform_3(%arg0: i32, %arg1: i32) -> (i32, i32, i32) {
    %c0_i32 = arith.constant 0 : i32
    %c0_i32_0 = arith.constant 0 : i32
    return %arg0, %arg1, %c0_i32 : i32, i32, i32
  }
}

</mosaic_0001>

<bundles_post_ra>
// kernel: tpu_custom_call.1
= control target key start
LH: loop header
LB: loop body
LE: loop exit
PB: predicated region body
PF: predicated region fallthrough
CT: control target
= control target key end

     0   :  { %8 = vsyncpa [#allocation3], 0  ;;  %s861_s0 = inlined_call_operand.vmem [shape: f32[2,64,12], index: 0, kind: input, shape index: {}]   ;;  %s862_s1 = inlined_call_operand.vmem [shape: f32[12,128], index: 1, kind: input, shape index: {}]   ;;  %s863_s2 = inlined_call_operand.vmem [shape: f32[64,128], index: 2, kind: input, shape index: {}]   ;;  %s864_s3 = inlined_call_operand.hbm [shape: f32[2,64,128], index: 3, kind: output, shape index: {}]  }
   0x1   :  { %10 = vsyncpa [#allocation3 + $0x1], 0  ;;  %s705_s12 = smov 0   ;;  %s707_s13 = smov 0  }
   0x2   :  { %s709_s14 = smov 0   ;;  %s711_s15 = smov 0  }
   0x3   :  { %s713_s16 = smov 0   ;;  %s715_s17 = smov 0  }
   0x4 LB: > { %s492_s18 = sadd.s32 4294967295, %s680_s17   ;;  %s493_s19 = sadd.s32 4294967294, %s680_s17   ;;  %s680_s17 = sphi %s715_s17, %s16_s17   ;;  %s676_s16 = sphi %s713_s16, %s871_s16   ;;  %s672_s15 = sphi %s711_s15, %s870_s15   ;;  %s668_s14 = sphi %s709_s14, %s869_s14   ;;  %s664_s13 = sphi %s707_s13, %s868_s13   ;;  %s660_s12 = sphi %s705_s12, %s867_s12  }
   0x5   : > { %s28_s20 = sadd.s32 1, %s676_s16  ;;  %s112_s21 = sadd.s32 1, %s668_s14 }
   0x6   : > { %p30_p0 = scmp.ge.s32.totalorder %s28_s20, 2  ;;  %p122_p1 = scmp.ne.s32.totalorder %s668_s14, %s664_s13 }
   0x7   : > { %p123_p2 = scmp.eq.s32.totalorder %s492_s18, 1  ;;  %p128_p3 = scmp.ne.s32.totalorder %s664_s13, %s660_s12 }
   0x8   : > { %s873_s20 = smov (%p30_p0, %s28_s20), 0  ;;  %p129_p5 = scmp.eq.s32.totalorder %s493_s19, 1 }
   0x9   : > { %p745_p4 = por %p123_p2, %p122_p1  ;;  %s107_s23 = ssub.s32 %s676_s16, %s873_s20 }
   0xa   : > { %p497_p6 = scmp.ge.s32.totalorder %s680_s17, 1  ;;  %p110_p7 = scmp.eq.s32.totalorder %s107_s23, 0 }
   0xb   : > { %p752_p8 = por %p129_p5, %p128_p3  ;;  %p172_p9 = scmp.lt.s32.totalorder %s680_s17, 3 }
   0xc   : > { %s758_s25 = scalar_select %p110_p7, %s668_s14, %s112_s21  }
   0xd   : > { %p173_p10 = pnand %p497_p6, %p172_p9 }
   0xe   : > { %p206_p11 = scmp.lt.s32.totalorder (!%p173_p10), %s672_s15, 1  ;;  %s202_s8 = sand.u32 (!%p173_p10), 1, %s664_s13  }
   0xf   : > { %176 = sbr.rel (%p173_p10) target bundleno = 242 (0xf2), region = 32  ;;  %s498_s9 = sshll.u32 (!%p173_p10), %s202_s8, 6 }
  0x10   : > { %s204_s5 = scalar_lea.vmem (!%p173_p10), [#allocation2], %s498_s9  ;;  %s516_s6 = sshll.u32 (!%p173_p10), %s672_s15, 10 }
  0x11   : > { %s810_s21 = scalar_lea.hbm (!%p173_p10), %s864_s3, %s516_s6  ;;  %s816_s23 = scalar_lea.sflag (!%p173_p10), [#allocation3], %s202_s8 }
  0x12   : > { %s682_s27 = smov (!%p173_p10), [#allocation2]  }
  0x13   : > { %s608_s28 = sshll.u32 (!%p173_p10), %s682_s27, 4  ;;  %s609_s28 = int_to_ptr.vmem [resolvable:$false] %s608_s28 }
  0x14   : > { %v231_v0 = vld [vmem:[%s862_s1 + $0x8] sm:$0xf]  ;;  %vm265_vm0 = vcmask 1043456   ;;  %v230_v1 = vld [vmem:[%s862_s1] sm:$0xff]  ;;  %s207_s30 = scalar_select %p206_p11, %s672_s15, 1  ;;  %vm240_vm1 = vcmask 97280  }
  0x15   : > { %527 = vmatprep.subr.msk.mxu0 %vm265_vm0, %v231_v0  ;;  %543 = vmatprep.subr.msk.mxu1 %vm265_vm0, %v231_v0  ;;  %v233_v10 = vld [vmem:[%s863_s2 + $0x8] sm:$0xff]  ;;  %v232_v14 = vld [vmem:[%s863_s2] sm:$0xff]  ;;  %v235_v20 = vld [vmem:[%s863_s2 + $0x18] sm:$0xff]  ;;  %s610_s29 = scalar_lea.vmem %s609_s28, 2048 }
  0x16   : > { %528 = vmatpush3.msk.msra.mxu0 %vm265_vm0, %v231_v0  ;;  %545 = vmatpush3.msk.msra.mxu1 %vm265_vm0, %v231_v0  ;;  %s515_s4 = sshll.u32 %s207_s30, 6  ;;  %v237_v11 = vld [vmem:[%s863_s2 + $0x28] sm:$0xff]  ;;  %v236_v15 = vld [vmem:[%s863_s2 + $0x20] sm:$0xff]  ;;  %v239_v21 = vld [vmem:[%s863_s2 + $0x38] sm:$0xff] }
  0x17   : > { %529 = vmatprep.subr.mxu0 %v230_v1  ;;  %544 = vmatprep.subr.mxu1 %v230_v1  ;;  %s213_s7 = scalar_lea.vmem %s861_s0, %s515_s4  ;;  %v234_v26 = vld [vmem:[%s863_s2 + $0x10] sm:$0xff] }
  0x18   : > { %530 = vmatpush3.msra.mxu0 %v230_v1  ;;  %546 = vmatpush3.msra.mxu1 %v230_v1  ;;  %v222_v2 = vld [vmem:[%s213_s7] sm:$0xff]  ;;  %v223_v4 = vld [vmem:[%s213_s7 + $0x8] sm:$0xff]  ;;  %v224_v6 = vld [vmem:[%s213_s7 + $0x10] sm:$0xff] }
  0x19   : > { %v226_v3 = vld [vmem:[%s213_s7 + $0x20] sm:$0xff]  ;;  %531 = vmatprep.mubr.msk.f32.mxu0 %vm240_vm1, %v222_v2  ;;  %v227_v5 = vld [vmem:[%s213_s7 + $0x28] sm:$0xff]  ;;  %v228_v7 = vld [vmem:[%s213_s7 + $0x30] sm:$0xff] }
  0x1a   : > { %537 = vmatprep.mubr.msk.f32.mxu1 %vm240_vm1, %v226_v3  ;;  %532 = vmatmul.mubr.msk.f32.vlgmr.msra.gmra.mxu0 %vm240_vm1, %v223_v4  ;;  %v225_v8 = vld [vmem:[%s213_s7 + $0x18] sm:$0xff]  ;;  %v238_v27 = vld [vmem:[%s863_s2 + $0x30] sm:$0xff] }
  0x1b   : > { %538 = vmatmul.mubr.msk.f32.vlgmr.msra.gmra.mxu1 %vm240_vm1, %v227_v5  ;;  %534 = vmatprep.mubr.msk.f32.mxu0 %vm240_vm1, %v224_v6  ;;  %v229_v9 = vld [vmem:[%s213_s7 + $0x38] sm:$0xff]  ;;  %s398_s7 = sshll.u32 %s204_s5, 4  ;;  %s812_s7 = int_to_ptr.vmem [resolvable:$true] %s398_s7 }
  0x1c   : > { %540 = vmatprep.mubr.msk.f32.mxu1 %vm240_vm1, %v228_v7  ;;  %s604_s26 = scalar_lea.vmem %s812_s7, 1024  ;;  %p611_p1 = scmp.lt.s32.totalorder %s812_s7, %s609_s28 }
  0x1d   : > { %p605_p12 = scmp.ne.s32.totalorder %s812_s7, %s604_s26  ;;  %p612_p2 = scmp.lt.s32.totalorder %s610_s29, %s604_s26 }
  0x1e   : > { %535 = vmatmul.mubr.msk.f32.gmra.mxu0 %vm240_vm1, %v225_v8 }
  0x1f   : > { %541 = vmatmul.mubr.msk.f32.gmra.mxu1 %vm240_vm1, %v229_v9  ;;  %p606_p13 = pnand %p605_p12, %p745_p4  ;;  %p613_p3 = por %p612_p2, %p611_p1 }
  0x21   : > { %p607_p0 = pneg %p606_p13 }
  0x23   : > { %p614_p5 = pnand %p613_p3, %p607_p0 }
  0xda   : > { %v533_v12 = vpop.f32.mrf.mxu0 }
  0xdb   : > { %v539_v13 = vpop.f32.mrf.mxu1  ;;  %v341_v16 = vadd.f32 %v533_v12, %v233_v10 }
  0xdc   : > { %v361_v17 = vadd.f32 %v539_v13, %v237_v11  ;;  %v335_v18 = vpop.f32.mrf.mxu0 }
  0xdd   : > { %v355_v19 = vpop.f32.mrf.mxu1  ;;  %375 = vst [vmem:[%s204_s5 + $0x8] sm:$0xff] %v341_v16  ;;  %v336_v22 = vadd.f32 %v335_v18, %v232_v14 }
  0xde   : > { %379 = vst [vmem:[%s204_s5 + $0x28] sm:$0xff] %v361_v17  ;;  %v356_v23 = vadd.f32 %v355_v19, %v236_v15  ;;  %v536_v24 = vpop.f32.mrf.mxu0 }
  0xdf   : > { %v542_v25 = vpop.f32.mrf.mxu1  ;;  %374 = vst [vmem:[%s204_s5] sm:$0xff] %v336_v22  ;;  %v351_v28 = vadd.f32 %v536_v24, %v235_v20 }
  0xe0   : > { %378 = vst [vmem:[%s204_s5 + $0x20] sm:$0xff] %v356_v23  ;;  %v371_v29 = vadd.f32 %v542_v25, %v239_v21  ;;  %v345_v30 = vpop.f32.mrf.mxu0 }
  0xe1   : > { %v365_v31 = vpop.f32.mrf.mxu1  ;;  %377 = vst [vmem:[%s204_s5 + $0x18] sm:$0xff] %v351_v28  ;;  %v346_v32 = vadd.f32 %v345_v30, %v234_v26 }
  0xe2   : > { %381 = vst [vmem:[%s204_s5 + $0x38] sm:$0xff] %v371_v29  ;;  %v366_v33 = vadd.f32 %v365_v31, %v238_v27 }
  0xe3   : > { %376 = vst [vmem:[%s204_s5 + $0x10] sm:$0xff] %v346_v32 }
  0xe4   : > { %380 = vst [vmem:[%s204_s5 + $0x30] sm:$0xff] %v366_v33 }
  0xe5   : > { %617 = shalt.err (!%p614_p5)
}
  0xe6   : > { %s618_s8 = scalar_lea.hbm %s810_s21, 1024  ;;  %s622_s5 = scalar_lea.hbm %s864_s3, 2048 }
  0xe7   : > { %p619_p6 = scmp.ne.s32.totalorder %s810_s21, %s618_s8  ;;  %p623_p10 = scmp.lt.s32.totalorder %s810_s21, %s864_s3 }
  0xe8   : > { %p624_p11 = scmp.lt.s32.totalorder %s622_s5, %s618_s8 }
  0xe9   : > { %p620_p7 = pnand %p619_p6, %p745_p4 }
  0xea   : > { %p625_p12 = por %p624_p11, %p623_p10 }
  0xeb   : > { %p621_p9 = pneg %p620_p7 }
  0xed   : > { %p626_p13 = pnand %p625_p12, %p621_p9 }
  0xef   : > { %629 = shalt.err (!%p626_p13)
}
  0xf0   : > { %s683_s11 = smov 128   ;;  %s684_s18 = smov 8  }
  0xf1   : > { %547 = dma.vmem_to_hbm [thread:$0]  (%p745_p4), %s812_s7, 1024, %s810_s21, %s816_s23, %s683_s11, %s683_s11, %s684_s18  }
  0xf2 PF: > { %p553_p0 = scmp.ge.s32.totalorder %s680_s17, 2  ;;  %s413_s19 = sand.u32 1, %s660_s12  }
  0xf3   : > { %s414_s15 = scalar_lea.sflag [#allocation3], %s413_s19 }
  0xf4   : > { %p550_p1 = pnand %p553_p0, %p752_p8 }
  0xf6   : > { %p551_p2 = pneg %p550_p1 }
  0xf8   : > { %655 = dma.done.wait (%p551_p2), %s414_s15, 1024  }
  0xf9   : > { %657 = vsyncadd (%p551_p2), %s414_s15, 4294966272  ;;  %s16_s17 = sadd.s32 1, %s680_s17   ;;  %s867_s12 = smov %s664_s13 }
  0xfa   : > { %p13_p3 = scmp.ge.s32.totalorder %s16_s17, 4   ;;  %s868_s13 = smov %s668_s14 }
  0xfb   : > { %s869_s14 = smov %s758_s25  ;;  %s870_s15 = smov %s676_s16 }
  0xfc   : > { %s871_s16 = smov %s873_s20  ;;  %15 = sbr.rel (!%p13_p3) target bundleno = 4 (0x4), region = 70 }
 0x101   :  { %419 = vsyncpa [#allocation3], 1 }
 0x102   :  { %421 = vsyncpa [#allocation3 + $0x1], 1 }

</bundles_post_ra>
